<compile_context>
chip_gen: v5e
topology: v5e:2x2
jax: 0.10.0
libtpu: 0.0.40
codegen_flags: <defaults>
</compile_context>

<pallas_src>
import jax
import jax.numpy as jnp
from jax.experimental import pallas as pl
from jax.experimental.pallas import tpu as pltpu

HIDDEN_PAD = 128          # lane-dense padded width for h1 / h2 / logits
DEFAULT_TILE_BATCH = 2048  # rows per grid step (multiple of 128)


def _round_up(a, m):
    return ((a + m - 1) // m) * m


def mlp_kernel(x_ref, w1_ref, b1_ref, w2_ref, b2_ref, w3_ref, b3_ref, o_ref):
    # Layer 1: (TB, D)bf16 @ (D, 128)bf16 -> f32, bias + ReLU in f32
    h1 = jnp.dot(x_ref[...], w1_ref[...], preferred_element_type=jnp.float32)
    h1 = jnp.maximum(h1 + b1_ref[...], 0.0)
    # Layer 2: (TB, 128)bf16 @ (128, 128)bf16 -> f32
    h2 = jnp.dot(h1.astype(jnp.bfloat16), w2_ref[...],
                 preferred_element_type=jnp.float32)
    h2 = jnp.maximum(h2 + b2_ref[...], 0.0)
    # Layer 3: (TB, 128)bf16 @ (128, 128)bf16 -> f32 logits (padded lanes = 0)
    h3 = jnp.dot(h2.astype(jnp.bfloat16), w3_ref[...],
                 preferred_element_type=jnp.float32)
    o_ref[...] = (h3 + b3_ref[...]).astype(o_ref.dtype)


def prepare_params(params, num_classes):
    """Pad weights/biases to lane-dense 128-wide slabs and cast weights to bf16."""
    def pad_w(w, in_pad, out_pad):
        fi, fo = w.shape
        wp = jnp.zeros((in_pad, out_pad), jnp.float32).at[:fi, :fo].set(w)
        return wp.astype(jnp.bfloat16)

    def pad_b(b, out_pad):
        b = jnp.asarray(b, jnp.float32).reshape(1, -1)
        return jnp.zeros((1, out_pad), jnp.float32).at[:, : b.shape[1]].set(b)

    input_size = params["w1"].shape[0]
    return {
        "w1": pad_w(params["w1"], input_size, HIDDEN_PAD),
        "b1": pad_b(params["b1"], HIDDEN_PAD),
        "w2": pad_w(params["w2"], HIDDEN_PAD, HIDDEN_PAD),
        "b2": pad_b(params["b2"], HIDDEN_PAD),
        "w3": pad_w(params["w3"], HIDDEN_PAD, HIDDEN_PAD),
        "b3": pad_b(params["b3"], HIDDEN_PAD),
        "num_classes": num_classes,
    }


def neural_net_forward(x, prepared, *, tile_batch=DEFAULT_TILE_BATCH):
    """x: (batch, input_size) f32/bf16. prepared: output of prepare_params."""
    w1, b1 = prepared["w1"], prepared["b1"]
    w2, b2 = prepared["w2"], prepared["b2"]
    w3, b3 = prepared["w3"], prepared["b3"]
    num_classes = prepared["num_classes"]

    batch, d = x.shape
    tb = min(tile_batch, _round_up(batch, 128))   # batch tile, multiple of 128
    padded_batch = _round_up(batch, tb)

    xb = x.astype(jnp.bfloat16)
    if padded_batch != batch:
        xb = jnp.pad(xb, ((0, padded_batch - batch), (0, 0)))

    grid = (padded_batch // tb,)
    const = lambda i: (0, 0)  # weights/biases: same block every step (VMEM-resident)

    out_padded = pl.pallas_call(
        mlp_kernel,
        out_shape=jax.ShapeDtypeStruct((padded_batch, HIDDEN_PAD), jnp.float32),
        grid=grid,
        in_specs=[
            pl.BlockSpec((tb, d), lambda i: (i, 0)),          # x tile
            pl.BlockSpec((d, HIDDEN_PAD), const),             # w1
            pl.BlockSpec((1, HIDDEN_PAD), const),             # b1
            pl.BlockSpec((HIDDEN_PAD, HIDDEN_PAD), const),    # w2
            pl.BlockSpec((1, HIDDEN_PAD), const),             # b2
            pl.BlockSpec((HIDDEN_PAD, HIDDEN_PAD), const),    # w3
            pl.BlockSpec((1, HIDDEN_PAD), const),             # b3
        ],
        out_specs=pl.BlockSpec((tb, HIDDEN_PAD), lambda i: (i, 0)),
        compiler_params=pltpu.CompilerParams(
            dimension_semantics=("parallel",),
        ),
    )(xb, w1, b1, w2, b2, w3, b3)

    return out_padded[:batch, :num_classes]


def init_params(key, input_size, num_classes):
    """Deterministic init mirroring nn.Linear default (uniform +-1/sqrt(fan_in))."""
    keys = jax.random.split(key, 6)

    def linear(kw, kb, fan_in, fan_out):
        bound = 1.0 / jnp.sqrt(fan_in)
        w = jax.random.uniform(kw, (fan_in, fan_out), jnp.float32, -bound, bound)
        b = jax.random.uniform(kb, (1, fan_out), jnp.float32, -bound, bound)
        return w, b

    w1, b1 = linear(keys[0], keys[1], input_size, 64)
    w2, b2 = linear(keys[2], keys[3], 64, 32)
    w3, b3 = linear(keys[4], keys[5], 32, num_classes)
    return {"w1": w1, "b1": b1, "w2": w2, "b2": b2, "w3": w3, "b3": b3}


if __name__ == "__main__":
    # Small synthetic shapes consistent with the module: feature_columns -> 16,
    # outcome_encoder classes -> 4.
    batch, input_size, num_classes = 8, 16, 4

    key = jax.random.PRNGKey(0)
    k_x, k_p = jax.random.split(key)
    x = jax.random.normal(k_x, (batch, input_size), dtype=jnp.float32)
    params = init_params(k_p, input_size, num_classes)
    prepared = prepare_params(params, num_classes)

    out = neural_net_forward(x, prepared)
    jax.block_until_ready(out)

    # Pure-JAX reference using the same bf16-input / f32-accumulate recipe.
    bf16 = jnp.bfloat16
    f32 = jnp.float32
    h1 = jnp.maximum(
        jnp.dot(x.astype(bf16), params["w1"].astype(bf16),
                preferred_element_type=f32) + params["b1"], 0.0)
    h2 = jnp.maximum(
        jnp.dot(h1.astype(bf16), params["w2"].astype(bf16),
                preferred_element_type=f32) + params["b2"], 0.0)
    ref = jnp.dot(h2.astype(bf16), params["w3"].astype(bf16),
                  preferred_element_type=f32) + params["b3"]

    assert out.shape == (batch, num_classes)
    assert jnp.allclose(out, ref, atol=1e-4, rtol=1e-4), "mismatch vs reference"

    print("KERNEL_OK")
</pallas_src>

<mosaic_0001>
module attributes {stable_mosaic.version = 11 : i64} {
  func.func @mlp_kernel(%arg0: i32, %arg1: memref<128x16xbf16, #tpu.memory_space<vmem>>, %arg2: memref<16x128xbf16, #tpu.memory_space<vmem>>, %arg3: memref<1x128xf32, #tpu.memory_space<vmem>>, %arg4: memref<128x128xbf16, #tpu.memory_space<vmem>>, %arg5: memref<1x128xf32, #tpu.memory_space<vmem>>, %arg6: memref<128x128xbf16, #tpu.memory_space<vmem>>, %arg7: memref<1x128xf32, #tpu.memory_space<vmem>>, %arg8: memref<128x128xf32, #tpu.memory_space<vmem>>) attributes {dimension_semantics = [#tpu.dimension_semantics<parallel>], iteration_bounds = array<i64: 1>, scalar_prefetch = 0 : i64, scratch_operands = 0 : i64, tpu.core_type = #tpu.core_type<tc>, window_params = [{transform_indices = @transform_0, window_bounds = array<i64: 128, 16>}, {pipeline_mode = #tpu.pipeline_mode<synchronous>, transform_indices = @transform_1, window_bounds = array<i64: 16, 128>}, {pipeline_mode = #tpu.pipeline_mode<synchronous>, transform_indices = @transform_2, window_bounds = array<i64: 1, 128>}, {pipeline_mode = #tpu.pipeline_mode<synchronous>, transform_indices = @transform_3, window_bounds = array<i64: 128, 128>}, {pipeline_mode = #tpu.pipeline_mode<synchronous>, transform_indices = @transform_4, window_bounds = array<i64: 1, 128>}, {pipeline_mode = #tpu.pipeline_mode<synchronous>, transform_indices = @transform_5, window_bounds = array<i64: 128, 128>}, {pipeline_mode = #tpu.pipeline_mode<synchronous>, transform_indices = @transform_6, window_bounds = array<i64: 1, 128>}, {transform_indices = @transform_7, window_bounds = array<i64: 128, 128>}]} {
    %c0 = arith.constant 0 : index
    %c0_0 = arith.constant 0 : index
    %0 = vector.load %arg1[%c0, %c0_0] : memref<128x16xbf16, #tpu.memory_space<vmem>>, vector<128x16xbf16>
    %c0_1 = arith.constant 0 : index
    %c0_2 = arith.constant 0 : index
    %1 = vector.load %arg2[%c0_1, %c0_2] : memref<16x128xbf16, #tpu.memory_space<vmem>>, vector<16x128xbf16>
    %cst = arith.constant dense<0.000000e+00> : vector<128x128xf32>
    %2 = tpu.matmul %0, %1, %cst {dimension_numbers = #tpu.dot_dimension_numbers<[1], [0], [0], [1], [0, 0, 1, 1], [], []>} : vector<128x16xbf16>, vector<16x128xbf16>, vector<128x128xf32> -> vector<128x128xf32>
    %c0_3 = arith.constant 0 : index
    %c0_4 = arith.constant 0 : index
    %3 = vector.load %arg3[%c0_3, %c0_4] : memref<1x128xf32, #tpu.memory_space<vmem>>, vector<1x128xf32>
    %4 = vector.broadcast %3 : vector<1x128xf32> to vector<128x128xf32>
    %5 = arith.addf %2, %4 : vector<128x128xf32>
    %cst_5 = arith.constant 0.000000e+00 : f32
    %6 = vector.broadcast %cst_5 : f32 to vector<128x128xf32>
    %7 = arith.maximumf %5, %6 : vector<128x128xf32>
    %8 = arith.truncf %7 : vector<128x128xf32> to vector<128x128xbf16>
    %c0_6 = arith.constant 0 : index
    %c0_7 = arith.constant 0 : index
    %9 = vector.load %arg4[%c0_6, %c0_7] : memref<128x128xbf16, #tpu.memory_space<vmem>>, vector<128x128xbf16>
    %cst_8 = arith.constant dense<0.000000e+00> : vector<128x128xf32>
    %10 = tpu.matmul %8, %9, %cst_8 {dimension_numbers = #tpu.dot_dimension_numbers<[1], [0], [0], [1], [0, 0, 1, 1], [], []>} : vector<128x128xbf16>, vector<128x128xbf16>, vector<128x128xf32> -> vector<128x128xf32>
    %c0_9 = arith.constant 0 : index
    %c0_10 = arith.constant 0 : index
    %11 = vector.load %arg5[%c0_9, %c0_10] : memref<1x128xf32, #tpu.memory_space<vmem>>, vector<1x128xf32>
    %12 = vector.broadcast %11 : vector<1x128xf32> to vector<128x128xf32>
    %13 = arith.addf %10, %12 : vector<128x128xf32>
    %cst_11 = arith.constant 0.000000e+00 : f32
    %14 = vector.broadcast %cst_11 : f32 to vector<128x128xf32>
    %15 = arith.maximumf %13, %14 : vector<128x128xf32>
    %16 = arith.truncf %15 : vector<128x128xf32> to vector<128x128xbf16>
    %c0_12 = arith.constant 0 : index
    %c0_13 = arith.constant 0 : index
    %17 = vector.load %arg6[%c0_12, %c0_13] : memref<128x128xbf16, #tpu.memory_space<vmem>>, vector<128x128xbf16>
    %cst_14 = arith.constant dense<0.000000e+00> : vector<128x128xf32>
    %18 = tpu.matmul %16, %17, %cst_14 {dimension_numbers = #tpu.dot_dimension_numbers<[1], [0], [0], [1], [0, 0, 1, 1], [], []>} : vector<128x128xbf16>, vector<128x128xbf16>, vector<128x128xf32> -> vector<128x128xf32>
    %c0_15 = arith.constant 0 : index
    %c0_16 = arith.constant 0 : index
    %19 = vector.load %arg7[%c0_15, %c0_16] : memref<1x128xf32, #tpu.memory_space<vmem>>, vector<1x128xf32>
    %20 = vector.broadcast %19 : vector<1x128xf32> to vector<128x128xf32>
    %21 = arith.addf %18, %20 : vector<128x128xf32>
    %c0_17 = arith.constant 0 : index
    %c0_18 = arith.constant 0 : index
    %22 = vector.load %arg8[%c0_17, %c0_18] : memref<128x128xf32, #tpu.memory_space<vmem>>, vector<128x128xf32>
    tpu.vector_store %arg8[%c0_17, %c0_18], %21 {strides = array<i32>} : memref<128x128xf32, #tpu.memory_space<vmem>>, vector<128x128xf32>,
    return
  }
  func.func @transform_0(%arg0: i32) -> (i32, i32) {
    %c0_i32 = arith.constant 0 : i32
    %c0_i32_0 = arith.constant 0 : i32
    return %arg0, %c0_i32 : i32, i32
  }
  func.func @transform_1(%arg0: i32) -> (i32, i32) {
    %c0_i32 = arith.constant 0 : i32
    %c0_i32_0 = arith.constant 0 : i32
    %c0_i32_1 = arith.constant 0 : i32
    return %c0_i32, %c0_i32_0 : i32, i32
  }
  func.func @transform_2(%arg0: i32) -> (i32, i32) {
    %c0_i32 = arith.constant 0 : i32
    %c0_i32_0 = arith.constant 0 : i32
    %c0_i32_1 = arith.constant 0 : i32
    return %c0_i32, %c0_i32_0 : i32, i32
  }
  func.func @transform_3(%arg0: i32) -> (i32, i32) {
    %c0_i32 = arith.constant 0 : i32
    %c0_i32_0 = arith.constant 0 : i32
    %c0_i32_1 = arith.constant 0 : i32
    return %c0_i32, %c0_i32_0 : i32, i32
  }
  func.func @transform_4(%arg0: i32) -> (i32, i32) {
    %c0_i32 = arith.constant 0 : i32
    %c0_i32_0 = arith.constant 0 : i32
    %c0_i32_1 = arith.constant 0 : i32
    return %c0_i32, %c0_i32_0 : i32, i32
  }
  func.func @transform_5(%arg0: i32) -> (i32, i32) {
    %c0_i32 = arith.constant 0 : i32
    %c0_i32_0 = arith.constant 0 : i32
    %c0_i32_1 = arith.constant 0 : i32
    return %c0_i32, %c0_i32_0 : i32, i32
  }
  func.func @transform_6(%arg0: i32) -> (i32, i32) {
    %c0_i32 = arith.constant 0 : i32
    %c0_i32_0 = arith.constant 0 : i32
    %c0_i32_1 = arith.constant 0 : i32
    return %c0_i32, %c0_i32_0 : i32, i32
  }
  func.func @transform_7(%arg0: i32) -> (i32, i32) {
    %c0_i32 = arith.constant 0 : i32
    %c0_i32_0 = arith.constant 0 : i32
    return %arg0, %c0_i32 : i32, i32
  }
}

</mosaic_0001>

<bundles_post_ra>
// kernel: tpu_custom_call.1
= control target key start
LH: loop header
LB: loop body
LE: loop exit
PB: predicated region body
PF: predicated region fallthrough
CT: control target
= control target key end

     0   :  { %12 = vsyncpa [#allocation3], 0  ;;  %s851_s0 = inlined_call_operand.vmem [shape: bf16[128,16], index: 0, kind: input, shape index: {}]   ;;  %s852_s1 = inlined_call_operand.vmem [shape: bf16[16,128], index: 1, kind: input, shape index: {}]   ;;  %s853_s2 = inlined_call_operand.vmem [shape: f32[1,128], index: 2, kind: input, shape index: {}]   ;;  %s854_s3 = inlined_call_operand.vmem [shape: bf16[128,128], index: 3, kind: input, shape index: {}]   ;;  %s855_s4 = inlined_call_operand.vmem [shape: f32[1,128], index: 4, kind: input, shape index: {}]   ;;  %s856_s5 = inlined_call_operand.hbm [shape: bf16[128,128], index: 5, kind: input, shape index: {}]   ;;  %s857_s6 = inlined_call_operand.vmem [shape: f32[1,128], index: 6, kind: input, shape index: {}]   ;;  %s858_s7 = inlined_call_operand.hbm [shape: f32[128,128], index: 7, kind: output, shape index: {}]  }
   0x1   :  { %13 = vsyncpa [#allocation4], 0  ;;  %s28_s26 = sshll.u32 %s856_s5, 4  ;;  %s713_s27 = smov [#allocation2]   ;;  %s29_s26 = int_to_ptr.hbm [resolvable:$true] %s28_s26 }
   0x2   :  { %s30_s28 = sshll.u32 %s713_s27, 4  ;;  %s714_s29 = smov 64   ;;  %s31_s28 = int_to_ptr.vmem [resolvable:$true] %s30_s28 }
   0x3   :  { %s715_s30 = smov 4  }
   0x4   :  { %36 = dma.hbm_to_vmem [thread:$0]  %s29_s26, 1024, %s31_s28, [#allocation3], %s714_s29, %s714_s29, %s715_s30  }
   0x5   :  { %709 = dma.done.wait [#allocation3], 1024  }
   0x6   :  { %710 = vsyncadd [#allocation3], 4294966272  ;;  %v619_v0 = vld [vmem:[%s852_s1] sm:$0xff]  ;;  %vm112_vm0 = vcmask 130048   ;;  %v612_v2 = vld [vmem:[%s851_s0 + $0x8] sm:$0xff]  ;;  %s490_s20 = sshll.u32 %s858_s7, 4  ;;  %s491_s20 = int_to_ptr.hbm [resolvable:$true] %s490_s20 }
   0x7   :  { %v611_v1 = vld [vmem:[%s851_s0] sm:$0xff]  ;;  %144 = vmatpush.bf16.msra.mxu0 %v619_v0  ;;  %v613_v3 = vld [vmem:[%s851_s0 + $0x10] sm:$0xff]  ;;  %v614_v4 = vld [vmem:[%s851_s0 + $0x18] sm:$0xff]  ;;  %s717_s21 = smov 128   ;;  %s718_s22 = smov 8  }
   0x8   :  { %v615_v5 = vld [vmem:[%s851_s0 + $0x20] sm:$0xff]  ;;  %v627_v6 = vld [vmem:[%s854_s3 + $0x38] sm:$0xff]  ;;  %v616_v7 = vld [vmem:[%s851_s0 + $0x28] sm:$0xff] }
   0x9   :  { %278 = vmatpush.bf16.msra.mxu1 %v627_v6  ;;  %636 = vmatpush.bf16.msra.mxu3 %v627_v6  ;;  %v626_v8 = vld [vmem:[%s854_s3 + $0x30] sm:$0xff]  ;;  %v625_v9 = vld [vmem:[%s854_s3 + $0x28] sm:$0xff]  ;;  %v624_v10 = vld [vmem:[%s854_s3 + $0x20] sm:$0xff] }
   0xa   :  { %539 = vmatmul.msk.bf16.vlgmr.msra.gmra.mxu0 %vm112_vm0, %v611_v1  ;;  %v623_v11 = vld [vmem:[%s854_s3 + $0x18] sm:$0xff]  ;;  %v617_v12 = vld [vmem:[%s851_s0 + $0x30] sm:$0xff]  ;;  %v621_v14 = vld [vmem:[%s854_s3 + $0x8] sm:$0xff] }
   0xb   :  { %v622_v13 = vld [vmem:[%s854_s3 + $0x10] sm:$0xff]  ;;  %v620_v15 = vld [vmem:[%s854_s3] sm:$0xff]  ;;  %v618_v16 = vld [vmem:[%s851_s0 + $0x38] sm:$0xff] }
   0xc   :  { %v824_v18 = vld [vmem:[%s853_s2] ss:$0 sm:$0xff]  ;;  %v635_v57 = vld [vmem:[#allocation2 + $0x38] sm:$0xff]  ;;  %v634_v61 = vld [vmem:[#allocation2 + $0x30] sm:$0xff] }
   0xd   :  { %279 = vmatpush.bf16.msra.mxu1 %v626_v8  ;;  %637 = vmatpush.bf16.msra.mxu3 %v626_v8  ;;  %v633_v63 = vld [vmem:[#allocation2 + $0x28] sm:$0xff]  ;;  %v632_v0 = vld [vmem:[#allocation2 + $0x20] sm:$0xff]  ;;  %v630_v8 = vld [vmem:[#allocation2 + $0x10] sm:$0xff] }
   0xe   :  { %419 = vmatpush.bf16.msra.mxu2 %v635_v57 }
  0x11   :  { %280 = vmatpush.bf16.msra.mxu1 %v625_v9  ;;  %638 = vmatpush.bf16.msra.mxu3 %v625_v9 }
  0x12   :  { %420 = vmatpush.bf16.msra.mxu2 %v634_v61 }
  0x15   :  { %281 = vmatpush.bf16.msra.mxu1 %v624_v10  ;;  %639 = vmatpush.bf16.msra.mxu3 %v624_v10  ;;  %v629_v10 = vld [vmem:[#allocation2 + $0x8] sm:$0xff] }
  0x16   :  { %421 = vmatpush.bf16.msra.mxu2 %v633_v63 }
  0x19   :  { %282 = vmatpush.bf16.msra.mxu1 %v623_v11  ;;  %640 = vmatpush.bf16.msra.mxu3 %v623_v11  ;;  %v628_v11 = vld [vmem:[#allocation2] sm:$0xff] }
  0x1a   :  { %540 = vmatmul.msk.bf16.gmra.mxu0 %vm112_vm0, %v612_v2  ;;  %422 = vmatpush.bf16.msra.mxu2 %v632_v0 }
  0x1d   :  { %283 = vmatpush.bf16.msra.mxu1 %v622_v13  ;;  %641 = vmatpush.bf16.msra.mxu3 %v622_v13 }
  0x21   :  { %284 = vmatpush.bf16.msra.mxu1 %v621_v14  ;;  %642 = vmatpush.bf16.msra.mxu3 %v621_v14 }
  0x25   :  { %285 = vmatpush.bf16.msra.mxu1 %v620_v15  ;;  %643 = vmatpush.bf16.msra.mxu3 %v620_v15 }
  0x29   :  { %644 = vmatpush.bf16.msrb.mxu3 %v635_v57 }
  0x2a   :  { %541 = vmatmul.msk.bf16.gmra.mxu0 %vm112_vm0, %v613_v3 }
  0x2d   :  { %645 = vmatpush.bf16.msrb.mxu3 %v634_v61 }
  0x31   :  { %646 = vmatpush.bf16.msrb.mxu3 %v633_v63 }
  0x35   :  { %647 = vmatpush.bf16.msrb.mxu3 %v632_v0 }
  0x3a   :  { %542 = vmatmul.msk.bf16.gmra.mxu0 %vm112_vm0, %v614_v4  ;;  %v631_v4 = vld [vmem:[#allocation2 + $0x18] sm:$0xff] }
  0x3b   :  { %423 = vmatpush.bf16.msra.mxu2 %v631_v4  ;;  %648 = vmatpush.bf16.msrb.mxu3 %v631_v4 }
  0x3f   :  { %424 = vmatpush.bf16.msra.mxu2 %v630_v8  ;;  %649 = vmatpush.bf16.msrb.mxu3 %v630_v8 }
  0x43   :  { %425 = vmatpush.bf16.msra.mxu2 %v629_v10  ;;  %650 = vmatpush.bf16.msrb.mxu3 %v629_v10 }
  0x47   :  { %426 = vmatpush.bf16.msra.mxu2 %v628_v11  ;;  %651 = vmatpush.bf16.msrb.mxu3 %v628_v11  ;;  %v660_v11 = vld [vmem:[%s857_s6] ss:$0 sm:$0xff]  ;;  %s716_s6 = smov [#allocation5]  }
  0x48   :  { %s488_s17 = sshll.u32 %s716_s6, 4  ;;  %s489_s17 = int_to_ptr.vmem [resolvable:$true] %s488_s17 }
  0x4a   :  { %543 = vmatmul.msk.bf16.gmra.mxu0 %vm112_vm0, %v615_v5 }
  0x5a   :  { %544 = vmatmul.msk.bf16.gmra.mxu0 %vm112_vm0, %v616_v7 }
  0x6a   :  { %545 = vmatmul.msk.bf16.gmra.mxu0 %vm112_vm0, %v617_v12 }
  0x7a   :  { %546 = vmatmul.msk.bf16.gmra.mxu0 %vm112_vm0, %v618_v16 }
  0x87   :  { %v146_v17 = vpop.f32.mrf.mxu0 }
  0x88   :  { %v147_v19 = vadd.f32 %v824_v18, %v146_v17 }
  0x8a   :  { %v186_v22 = vmax.f32 %v147_v19, 0.0 }
  0x8f   :  { %v148_v20 = vpop.f32.mrf.mxu0 }
  0x90   :  { %v149_v21 = vadd.f32 %v824_v18, %v148_v20  ;;  %v659_v20 = vld [vmem:[%s855_s4] ss:$0 sm:$0xff] }
  0x92   :  { %v187_v23 = vmax.f32 %v149_v21, 0.0 }
  0x94   :  { %v202_v24 = vpack.c.bf16 %v187_v23, %v186_v22 }
  0x96   :  { %286 = vmatmul.bf16.vlgmr.msra.gmra.mxu1 %v202_v24 }
  0x97   :  { %v151_v25 = vpop.f32.mrf.mxu0 }
  0x98   :  { %v152_v26 = vadd.f32 %v824_v18, %v151_v25 }
  0x9a   :  { %v188_v29 = vmax.f32 %v152_v26, 0.0 }
  0x9f   :  { %v153_v27 = vpop.f32.mrf.mxu0 }
  0xa0   :  { %v154_v28 = vadd.f32 %v824_v18, %v153_v27 }
  0xa2   :  { %v189_v30 = vmax.f32 %v154_v28, 0.0 }
  0xa4   :  { %v203_v31 = vpack.c.bf16 %v189_v30, %v188_v29 }
  0xa6   :  { %291 = vmatmul.bf16.gmra.mxu1 %v203_v31 }
  0xa7   :  { %v156_v32 = vpop.f32.mrf.mxu0 }
  0xa8   :  { %v157_v33 = vadd.f32 %v824_v18, %v156_v32 }
  0xaa   :  { %v190_v36 = vmax.f32 %v157_v33, 0.0 }
  0xaf   :  { %v158_v34 = vpop.f32.mrf.mxu0 }
  0xb0   :  { %v159_v35 = vadd.f32 %v824_v18, %v158_v34 }
  0xb2   :  { %v191_v37 = vmax.f32 %v159_v35, 0.0 }
  0xb4   :  { %v204_v38 = vpack.c.bf16 %v191_v37, %v190_v36 }
  0xb6   :  { %296 = vmatmul.bf16.gmra.mxu1 %v204_v38 }
  0xb7   :  { %v161_v39 = vpop.f32.mrf.mxu0 }
  0xb8   :  { %v162_v40 = vadd.f32 %v824_v18, %v161_v39 }
  0xba   :  { %v192_v43 = vmax.f32 %v162_v40, 0.0 }
  0xbf   :  { %v163_v41 = vpop.f32.mrf.mxu0 }
  0xc0   :  { %v164_v42 = vadd.f32 %v824_v18, %v163_v41 }
  0xc2   :  { %v193_v44 = vmax.f32 %v164_v42, 0.0 }
  0xc4   :  { %v205_v45 = vpack.c.bf16 %v193_v44, %v192_v43 }
  0xc6   :  { %301 = vmatmul.bf16.gmra.mxu1 %v205_v45 }
  0xc7   :  { %v166_v46 = vpop.f32.mrf.mxu0 }
  0xc8   :  { %v167_v47 = vadd.f32 %v824_v18, %v166_v46 }
  0xca   :  { %v194_v50 = vmax.f32 %v167_v47, 0.0 }
  0xcf   :  { %v168_v48 = vpop.f32.mrf.mxu0 }
  0xd0   :  { %v169_v49 = vadd.f32 %v824_v18, %v168_v48 }
  0xd2   :  { %v195_v51 = vmax.f32 %v169_v49, 0.0 }
  0xd4   :  { %v206_v52 = vpack.c.bf16 %v195_v51, %v194_v50 }
  0xd6   :  { %306 = vmatmul.bf16.gmra.mxu1 %v206_v52 }
  0xd7   :  { %v171_v53 = vpop.f32.mrf.mxu0 }
  0xd8   :  { %v172_v54 = vadd.f32 %v824_v18, %v171_v53 }
  0xda   :  { %v196_v58 = vmax.f32 %v172_v54, 0.0 }
  0xdf   :  { %v173_v55 = vpop.f32.mrf.mxu0 }
  0xe0   :  { %v174_v56 = vadd.f32 %v824_v18, %v173_v55 }
  0xe2   :  { %v197_v59 = vmax.f32 %v174_v56, 0.0 }
  0xe4   :  { %v207_v60 = vpack.c.bf16 %v197_v59, %v196_v58 }
  0xe6   :  { %311 = vmatmul.bf16.gmra.mxu1 %v207_v60 }
  0xe7   :  { %v176_v62 = vpop.f32.mrf.mxu0 }
  0xe8   :  { %v177_v1 = vadd.f32 %v824_v18, %v176_v62 }
  0xea   :  { %v198_v5 = vmax.f32 %v177_v1, 0.0 }
  0xef   :  { %v178_v2 = vpop.f32.mrf.mxu0 }
  0xf0   :  { %v179_v3 = vadd.f32 %v824_v18, %v178_v2 }
  0xf2   :  { %v199_v6 = vmax.f32 %v179_v3, 0.0 }
  0xf4   :  { %v208_v7 = vpack.c.bf16 %v199_v6, %v198_v5 }
  0xf6   :  { %316 = vmatmul.bf16.vlgmr.msra.gmra.mxu3 %v208_v7 }
  0xf7   :  { %v181_v9 = vpop.f32.mrf.mxu0 }
  0xf8   :  { %v182_v12 = vadd.f32 %v824_v18, %v181_v9 }
  0xfa   :  { %v200_v15 = vmax.f32 %v182_v12, 0.0 }
  0xff   :  { %v183_v13 = vpop.f32.mrf.mxu0 }
 0x100   :  { %v184_v14 = vadd.f32 %v824_v18, %v183_v13 }
 0x102   :  { %v201_v16 = vmax.f32 %v184_v14, 0.0 }
 0x104   :  { %v209_v17 = vpack.c.bf16 %v201_v16, %v200_v15 }
 0x106   :  { %321 = vmatmul.bf16.gmra.mxu3 %v209_v17 }
 0x113   :  { %v287_v19 = vpop.f32.mrf.mxu1 }
 0x114   :  { %v288_v21 = vadd.f32 %v659_v20, %v287_v19 }
 0x116   :  { %v327_v24 = vmax.f32 %v288_v21, 0.0 }
 0x11b   :  { %v289_v22 = vpop.f32.mrf.mxu1 }
 0x11c   :  { %v290_v23 = vadd.f32 %v659_v20, %v289_v22 }
 0x11e   :  { %v328_v25 = vmax.f32 %v290_v23, 0.0 }
 0x120   :  { %v343_v26 = vpack.c.bf16 %v328_v25, %v327_v24 }
 0x122   :  { %427 = vmatmul.bf16.vlgmr.msra.gmra.mxu2 %v343_v26 }
 0x123   :  { %v292_v27 = vpop.f32.mrf.mxu1 }
 0x124   :  { %v293_v28 = vadd.f32 %v659_v20, %v292_v27 }
 0x126   :  { %v329_v30 = vmax.f32 %v293_v28, 0.0 }
 0x12b   :  { %v294_v29 = vpop.f32.mrf.mxu1 }
 0x12c   :  { %v295_v18 = vadd.f32 %v659_v20, %v294_v29 }
 0x12e   :  { %v330_v31 = vmax.f32 %v295_v18, 0.0 }
 0x130   :  { %v344_v32 = vpack.c.bf16 %v330_v31, %v329_v30 }
 0x132   :  { %432 = vmatmul.bf16.gmra.mxu2 %v344_v32 }
 0x133   :  { %v297_v33 = vpop.f32.mrf.mxu1 }
 0x134   :  { %v298_v34 = vadd.f32 %v659_v20, %v297_v33 }
 0x136   :  { %v331_v37 = vmax.f32 %v298_v34, 0.0 }
 0x13b   :  { %v299_v35 = vpop.f32.mrf.mxu1 }
 0x13c   :  { %v300_v36 = vadd.f32 %v659_v20, %v299_v35 }
 0x13e   :  { %v332_v38 = vmax.f32 %v300_v36, 0.0 }
 0x140   :  { %v345_v39 = vpack.c.bf16 %v332_v38, %v331_v37 }
 0x142   :  { %437 = vmatmul.bf16.gmra.mxu2 %v345_v39 }
 0x143   :  { %v302_v40 = vpop.f32.mrf.mxu1 }
 0x144   :  { %v303_v41 = vadd.f32 %v659_v20, %v302_v40 }
 0x146   :  { %v333_v44 = vmax.f32 %v303_v41, 0.0 }
 0x14b   :  { %v304_v42 = vpop.f32.mrf.mxu1 }
 0x14c   :  { %v305_v43 = vadd.f32 %v659_v20, %v304_v42 }
 0x14e   :  { %v334_v45 = vmax.f32 %v305_v43, 0.0 }
 0x150   :  { %v346_v46 = vpack.c.bf16 %v334_v45, %v333_v44 }
 0x152   :  { %442 = vmatmul.bf16.gmra.mxu2 %v346_v46 }
 0x153   :  { %v307_v47 = vpop.f32.mrf.mxu1 }
 0x154   :  { %v308_v48 = vadd.f32 %v659_v20, %v307_v47 }
 0x156   :  { %v335_v51 = vmax.f32 %v308_v48, 0.0 }
 0x15b   :  { %v309_v49 = vpop.f32.mrf.mxu1 }
 0x15c   :  { %v310_v50 = vadd.f32 %v659_v20, %v309_v49 }
 0x15e   :  { %v336_v52 = vmax.f32 %v310_v50, 0.0 }
 0x160   :  { %v347_v53 = vpack.c.bf16 %v336_v52, %v335_v51 }
 0x162   :  { %447 = vmatmul.bf16.gmra.mxu2 %v347_v53 }
 0x163   :  { %v312_v54 = vpop.f32.mrf.mxu1 }
 0x164   :  { %v313_v55 = vadd.f32 %v659_v20, %v312_v54 }
 0x166   :  { %v337_v58 = vmax.f32 %v313_v55, 0.0 }
 0x16b   :  { %v314_v56 = vpop.f32.mrf.mxu1 }
 0x16c   :  { %v315_v57 = vadd.f32 %v659_v20, %v314_v56 }
 0x16e   :  { %v338_v59 = vmax.f32 %v315_v57, 0.0 }
 0x170   :  { %v348_v60 = vpack.c.bf16 %v338_v59, %v337_v58 }
 0x172   :  { %452 = vmatmul.bf16.gmra.mxu2 %v348_v60 }
 0x179   :  { %v317_v61 = vpop.f32.mrf.mxu3 }
 0x17a   :  { %v318_v62 = vadd.f32 %v659_v20, %v317_v61 }
 0x17c   :  { %v339_v1 = vmax.f32 %v318_v62, 0.0 }
 0x181   :  { %v319_v63 = vpop.f32.mrf.mxu3 }
 0x182   :  { %v320_v0 = vadd.f32 %v659_v20, %v319_v63 }
 0x184   :  { %v340_v2 = vmax.f32 %v320_v0, 0.0 }
 0x186   :  { %v349_v3 = vpack.c.bf16 %v340_v2, %v339_v1 }
 0x188   :  { %457 = vmatmul.bf16.vlgmr.msrb.gmra.mxu3 %v349_v3 }
 0x189   :  { %v322_v4 = vpop.f32.mrf.mxu3 }
 0x18a   :  { %v323_v5 = vadd.f32 %v659_v20, %v322_v4 }
 0x18c   :  { %v341_v8 = vmax.f32 %v323_v5, 0.0 }
 0x191   :  { %v324_v6 = vpop.f32.mrf.mxu3 }
 0x192   :  { %v325_v7 = vadd.f32 %v659_v20, %v324_v6 }
 0x194   :  { %v342_v9 = vmax.f32 %v325_v7, 0.0 }
 0x196   :  { %v350_v10 = vpack.c.bf16 %v342_v9, %v341_v8 }
 0x198   :  { %462 = vmatmul.bf16.gmra.mxu3 %v350_v10 }
 0x1a5   :  { %v428_v12 = vpop.f32.mrf.mxu2 }
 0x1a6   :  { %v429_v13 = vadd.f32 %v660_v11, %v428_v12 }
 0x1a8   :  { %468 = vst [vmem:[#allocation5] sm:$0xff] %v429_v13 }
 0x1ad   :  { %v430_v14 = vpop.f32.mrf.mxu2 }
 0x1ae   :  { %v431_v15 = vadd.f32 %v660_v11, %v430_v14 }
 0x1b0   :  { %469 = vst [vmem:[#allocation5 + $0x8] sm:$0xff] %v431_v15 }
 0x1b5   :  { %v433_v16 = vpop.f32.mrf.mxu2 }
 0x1b6   :  { %v434_v17 = vadd.f32 %v660_v11, %v433_v16 }
 0x1b8   :  { %470 = vst [vmem:[#allocation5 + $0x10] sm:$0xff] %v434_v17 }
 0x1bd   :  { %v435_v19 = vpop.f32.mrf.mxu2 }
 0x1be   :  { %v436_v21 = vadd.f32 %v660_v11, %v435_v19 }
 0x1c0   :  { %471 = vst [vmem:[#allocation5 + $0x18] sm:$0xff] %v436_v21 }
 0x1c5   :  { %v438_v20 = vpop.f32.mrf.mxu2 }
 0x1c6   :  { %v439_v22 = vadd.f32 %v660_v11, %v438_v20 }
 0x1c8   :  { %472 = vst [vmem:[#allocation5 + $0x20] sm:$0xff] %v439_v22 }
 0x1cd   :  { %v440_v23 = vpop.f32.mrf.mxu2 }
 0x1ce   :  { %v441_v24 = vadd.f32 %v660_v11, %v440_v23 }
 0x1d0   :  { %473 = vst [vmem:[#allocation5 + $0x28] sm:$0xff] %v441_v24 }
 0x1d5   :  { %v443_v25 = vpop.f32.mrf.mxu2 }
 0x1d6   :  { %v444_v26 = vadd.f32 %v660_v11, %v443_v25 }
 0x1d8   :  { %474 = vst [vmem:[#allocation5 + $0x30] sm:$0xff] %v444_v26 }
 0x1dd   :  { %v445_v27 = vpop.f32.mrf.mxu2 }
 0x1de   :  { %v446_v28 = vadd.f32 %v660_v11, %v445_v27 }
 0x1e0   :  { %475 = vst [vmem:[#allocation5 + $0x38] sm:$0xff] %v446_v28 }
 0x1e5   :  { %v448_v29 = vpop.f32.mrf.mxu2 }
 0x1e6   :  { %v449_v18 = vadd.f32 %v660_v11, %v448_v29 }
 0x1e8   :  { %476 = vst [vmem:[#allocation5 + $0x40] sm:$0xff] %v449_v18 }
 0x1ed   :  { %v450_v30 = vpop.f32.mrf.mxu2 }
 0x1ee   :  { %v451_v31 = vadd.f32 %v660_v11, %v450_v30 }
 0x1f0   :  { %477 = vst [vmem:[#allocation5 + $0x48] sm:$0xff] %v451_v31 }
 0x1f5   :  { %v453_v32 = vpop.f32.mrf.mxu2 }
 0x1f6   :  { %v454_v33 = vadd.f32 %v660_v11, %v453_v32 }
 0x1f8   :  { %478 = vst [vmem:[#allocation5 + $0x50] sm:$0xff] %v454_v33 }
 0x1fd   :  { %v455_v34 = vpop.f32.mrf.mxu2 }
 0x1fe   :  { %v456_v35 = vadd.f32 %v660_v11, %v455_v34 }
 0x200   :  { %479 = vst [vmem:[#allocation5 + $0x58] sm:$0xff] %v456_v35 }
 0x20b   :  { %v458_v36 = vpop.f32.mrf.mxu3 }
 0x20c   :  { %v459_v37 = vadd.f32 %v660_v11, %v458_v36 }
 0x20e   :  { %480 = vst [vmem:[#allocation5 + $0x60] sm:$0xff] %v459_v37 }
 0x213   :  { %v460_v38 = vpop.f32.mrf.mxu3 }
 0x214   :  { %v461_v39 = vadd.f32 %v660_v11, %v460_v38 }
 0x216   :  { %481 = vst [vmem:[#allocation5 + $0x68] sm:$0xff] %v461_v39 }
 0x21b   :  { %v463_v40 = vpop.f32.mrf.mxu3 }
 0x21c   :  { %v464_v41 = vadd.f32 %v660_v11, %v463_v40 }
 0x21e   :  { %482 = vst [vmem:[#allocation5 + $0x70] sm:$0xff] %v464_v41 }
 0x223   :  { %v465_v42 = vpop.f32.mrf.mxu3 }
 0x224   :  { %v466_v43 = vadd.f32 %v660_v11, %v465_v42 }
 0x226   :  { %483 = vst [vmem:[#allocation5 + $0x78] sm:$0xff] %v466_v43 }
 0x227   :  { %496 = dma.vmem_to_hbm [thread:$0]  %s489_s17, 2048, %s491_s20, [#allocation4], %s717_s21, %s717_s21, %s718_s22  }
 0x228   :  { %711 = dma.done.wait [#allocation4], 2048  }
 0x229   :  { %712 = vsyncadd [#allocation4], 4294965248 }
 0x22a   :  { %501 = vsyncpa [#allocation3], 1 }
 0x22b   :  { %502 = vsyncpa [#allocation4], 1 }

</bundles_post_ra>
